<compile_context>
chip_gen: v7x
topology: tpu7x:2x2x1
jax: 0.10.0
libtpu: 0.0.40
codegen_flags: <defaults>
</compile_context>

<pallas_src>
import functools

import jax
import jax.numpy as jnp
from jax.experimental import pallas as pl
from jax.experimental.pallas import tpu as pltpu


def _round_up(x, m):
    return (x + m - 1) // m * m


def _focal_loss_kernel(x_ref, t_ref, o_ref, *, gamma, tile_rows, c_pad,
                       n_rows, n_cols, needs_mask):
    """One grid step: compute focal loss on a (tile_rows, c_pad) tile and
    write an (8, c_pad) lane-parallel partial sum."""
    i = pl.program_id(0)

    x = x_ref[...].astype(jnp.float32)
    t = t_ref[...].astype(jnp.float32)

    s = jax.nn.sigmoid(x)
    one_minus_s = 1.0 - s

    # Integer gamma -> multiply chain on the VPU (no EUP pow).
    pos_loss = -t * jax.lax.integer_pow(one_minus_s, gamma) \
        * jnp.log(s + 1e-10) * 2.0
    neg_loss = -(1.0 - t) * jax.lax.integer_pow(s, gamma) \
        * jnp.log(one_minus_s + 1e-10)
    loss = pos_loss + neg_loss

    if needs_mask:
        row = jax.lax.broadcasted_iota(jnp.int32, (tile_rows, c_pad), 0) \
            + i * tile_rows
        col = jax.lax.broadcasted_iota(jnp.int32, (tile_rows, c_pad), 1)
        loss = jnp.where((row < n_rows) & (col < n_cols), loss, 0.0)

    # Sublane-group reduce (tile_rows, c_pad) -> (8, c_pad): pure VPU adds,
    # stays lane-parallel; the final cross-lane reduce is done in JAX.
    partial = loss.reshape(tile_rows // 8, 8, c_pad).sum(axis=0)
    o_ref[...] = partial


def multilabel_focal_loss(inputs, targets, gamma=4,
                          target_block_bytes=2 * 1024 * 1024):
    """Pallas implementation of MultiLabelFocalLoss.forward -> scalar mean loss."""
    assert inputs.shape == targets.shape
    assert inputs.ndim == 2
    gamma = int(gamma)

    n, c = inputs.shape
    c_pad = _round_up(c, 128)

    # Pick tile_rows so one input block is ~target_block_bytes (0.5-2 MiB zone),
    # rounded to a sublane multiple and clamped to the (padded) batch size.
    itemsize = max(jnp.dtype(inputs.dtype).itemsize,
                   jnp.dtype(targets.dtype).itemsize)
    tile_rows = (target_block_bytes // (c_pad * itemsize)) // 8 * 8
    tile_rows = max(8, tile_rows)
    tile_rows = min(tile_rows, _round_up(n, 8))
    n_pad = _round_up(n, tile_rows)

    needs_mask = (n_pad != n) or (c_pad != c)
    if needs_mask:
        pad = ((0, n_pad - n), (0, c_pad - c))
        inputs = jnp.pad(inputs, pad)
        targets = jnp.pad(targets, pad)

    num_tiles = n_pad // tile_rows

    kernel = functools.partial(
        _focal_loss_kernel,
        gamma=gamma,
        tile_rows=tile_rows,
        c_pad=c_pad,
        n_rows=n,
        n_cols=c,
        needs_mask=needs_mask,
    )

    partials = pl.pallas_call(
        kernel,
        out_shape=jax.ShapeDtypeStruct((num_tiles * 8, c_pad), jnp.float32),
        grid_spec=pltpu.PrefetchScalarGridSpec(
            num_scalar_prefetch=0,
            grid=(num_tiles,),
            in_specs=[
                pl.BlockSpec((tile_rows, c_pad), lambda i: (i, 0)),
                pl.BlockSpec((tile_rows, c_pad), lambda i: (i, 0)),
            ],
            # Independent (8, c_pad) partial per grid step -> axis can be
            # "parallel" (both v7x TensorCores usable).
            out_specs=pl.BlockSpec((8, c_pad), lambda i: (i, 0)),
        ),
        compiler_params=pltpu.CompilerParams(
            dimension_semantics=("parallel",),
        ),
    )(inputs, targets)

    # Tiny final reduction + mean in plain JAX (partials are ~1/(tile_rows/8)
    # of the input volume, negligible).
    return jnp.sum(partials) / (n * c)


def _reference(inputs, targets, gamma=4):
    s = jax.nn.sigmoid(inputs.astype(jnp.float32))
    t = targets.astype(jnp.float32)
    pos = -t * (1 - s) ** gamma * jnp.log(s + 1e-10) * 2
    neg = -(1 - t) * s ** gamma * jnp.log(1 - s + 1e-10)
    return jnp.mean(pos + neg)


if __name__ == "__main__":
    key = jax.random.PRNGKey(0)
    k1, k2 = jax.random.split(key)

    # Small multi-label classification problem: batch=16, num_classes=128.
    N, C = 16, 128
    inputs = jax.random.normal(k1, (N, C), dtype=jnp.float32) * 2.0
    targets = (jax.random.uniform(k2, (N, C)) < 0.3).astype(jnp.float32)

    loss = multilabel_focal_loss(inputs, targets, gamma=4)
    loss = jax.block_until_ready(loss)

    ref = _reference(inputs, targets, gamma=4)
    assert jnp.allclose(loss, ref, rtol=1e-5, atol=1e-6), (loss, ref)

    # Also exercise a non-aligned shape (hits padding + in-kernel masking path).
    N2, C2 = 13, 200
    x2 = jax.random.normal(k1, (N2, C2), dtype=jnp.float32)
    t2 = (jax.random.uniform(k2, (N2, C2)) < 0.3).astype(jnp.float32)
    loss2 = jax.block_until_ready(multilabel_focal_loss(x2, t2, gamma=4))
    ref2 = _reference(x2, t2, gamma=4)
    assert jnp.allclose(loss2, ref2, rtol=1e-5, atol=1e-6), (loss2, ref2)

    print("KERNEL_OK")
</pallas_src>

<mosaic_0001>
module attributes {stable_mosaic.version = 11 : i64} {
  func.func @_focal_loss_kernel(%arg0: i32, %arg1: memref<16x128xf32, #tpu.memory_space<vmem>>, %arg2: memref<16x128xf32, #tpu.memory_space<vmem>>, %arg3: memref<8x128xf32, #tpu.memory_space<vmem>>) attributes {dimension_semantics = [#tpu.dimension_semantics<parallel>], iteration_bounds = array<i64: 1>, scalar_prefetch = 0 : i64, scratch_operands = 0 : i64, tpu.core_type = #tpu.core_type<tc>, window_params = [{transform_indices = @transform_0, window_bounds = array<i64: 16, 128>}, {transform_indices = @transform_1, window_bounds = array<i64: 16, 128>}, {transform_indices = @transform_2, window_bounds = array<i64: 8, 128>}]} {
    %c0 = arith.constant 0 : index
    %c0_0 = arith.constant 0 : index
    %0 = vector.load %arg1[%c0, %c0_0] : memref<16x128xf32, #tpu.memory_space<vmem>>, vector<16x128xf32>
    %c0_1 = arith.constant 0 : index
    %c0_2 = arith.constant 0 : index
    %1 = vector.load %arg2[%c0_1, %c0_2] : memref<16x128xf32, #tpu.memory_space<vmem>>, vector<16x128xf32>
    %2 = arith.negf %0 : vector<16x128xf32>
    %3 = math.exp %2 : vector<16x128xf32>
    %cst = arith.constant 1.000000e+00 : f32
    %4 = vector.broadcast %cst : f32 to vector<16x128xf32>
    %5 = arith.addf %4, %3 : vector<16x128xf32>
    %6 = arith.divf %4, %5 : vector<16x128xf32>
    %cst_3 = arith.constant 1.000000e+00 : f32
    %7 = vector.broadcast %cst_3 : f32 to vector<16x128xf32>
    %8 = arith.subf %7, %6 : vector<16x128xf32>
    %cst_4 = arith.constant 0.000000e+00 : f32
    %9 = vector.broadcast %cst_4 : f32 to vector<16x128xf32>
    %10 = arith.subf %9, %1 : vector<16x128xf32>
    %11 = arith.mulf %8, %8 : vector<16x128xf32>
    %12 = arith.mulf %11, %11 : vector<16x128xf32>
    %13 = arith.mulf %10, %12 : vector<16x128xf32>
    %cst_5 = arith.constant 1.000000e-10 : f32
    %14 = vector.broadcast %cst_5 : f32 to vector<16x128xf32>
    %15 = arith.addf %6, %14 : vector<16x128xf32>
    %16 = math.log %15 : vector<16x128xf32>
    %17 = arith.mulf %13, %16 : vector<16x128xf32>
    %cst_6 = arith.constant 2.000000e+00 : f32
    %18 = vector.broadcast %cst_6 : f32 to vector<16x128xf32>
    %19 = arith.mulf %17, %18 : vector<16x128xf32>
    %cst_7 = arith.constant 1.000000e+00 : f32
    %20 = vector.broadcast %cst_7 : f32 to vector<16x128xf32>
    %21 = arith.subf %20, %1 : vector<16x128xf32>
    %cst_8 = arith.constant 0.000000e+00 : f32
    %22 = vector.broadcast %cst_8 : f32 to vector<16x128xf32>
    %23 = arith.subf %22, %21 : vector<16x128xf32>
    %24 = arith.mulf %6, %6 : vector<16x128xf32>
    %25 = arith.mulf %24, %24 : vector<16x128xf32>
    %26 = arith.mulf %23, %25 : vector<16x128xf32>
    %cst_9 = arith.constant 1.000000e-10 : f32
    %27 = vector.broadcast %cst_9 : f32 to vector<16x128xf32>
    %28 = arith.addf %8, %27 : vector<16x128xf32>
    %29 = math.log %28 : vector<16x128xf32>
    %30 = arith.mulf %26, %29 : vector<16x128xf32>
    %31 = arith.addf %19, %30 : vector<16x128xf32>
    %32 = vector.shape_cast %31 : vector<16x128xf32> to vector<2x8x128xf32>
    %cst_10 = arith.constant dense<0.000000e+00> : vector<8x128xf32>
    %33 = vector.multi_reduction <add>, %32, %cst_10 [0] : vector<2x8x128xf32> to vector<8x128xf32>
    %c0_11 = arith.constant 0 : index
    %c0_12 = arith.constant 0 : index
    %34 = vector.load %arg3[%c0_11, %c0_12] : memref<8x128xf32, #tpu.memory_space<vmem>>, vector<8x128xf32>
    tpu.vector_store %arg3[%c0_11, %c0_12], %33 {strides = array<i32>} : memref<8x128xf32, #tpu.memory_space<vmem>>, vector<8x128xf32>,
    return
  }
  func.func @transform_0(%arg0: i32) -> (i32, i32) {
    %c0_i32 = arith.constant 0 : i32
    %c0_i32_0 = arith.constant 0 : i32
    return %arg0, %c0_i32 : i32, i32
  }
  func.func @transform_1(%arg0: i32) -> (i32, i32) {
    %c0_i32 = arith.constant 0 : i32
    %c0_i32_0 = arith.constant 0 : i32
    return %arg0, %c0_i32 : i32, i32
  }
  func.func @transform_2(%arg0: i32) -> (i32, i32) {
    %c0_i32 = arith.constant 0 : i32
    %c0_i32_0 = arith.constant 0 : i32
    return %arg0, %c0_i32 : i32, i32
  }
}

</mosaic_0001>

<bundles_post_ra>
// kernel: tpu_custom_call.1
= control target key start
LH: loop header
LB: loop body
LE: loop exit
PB: predicated region body
PF: predicated region fallthrough
CT: control target
= control target key end

     0   :  { %7 = vsyncpa [#allocation3], 0  ;;  %s265_s0 = inlined_call_operand.hbm [shape: f32[16,128], index: 0, kind: input, shape index: {}]   ;;  %s266_s1 = inlined_call_operand.hbm [shape: f32[16,128], index: 1, kind: input, shape index: {}]   ;;  %s267_s2 = inlined_call_operand.hbm [shape: f32[8,128], index: 2, kind: output, shape index: {}]  }
   0x1   :  { %8 = vsyncpa [#allocation6], 0 }
   0x2   :  { %9 = vsyncpa [#allocation4], 0  ;;  %s209_s9 = smov [#allocation2]   ;;  %s137_s13 = scalar_lea.hbm %s265_s0, 256 }
   0x3   :  { %s15_s10 = sshll.u32 %s209_s9, 4  ;;  %p138_p0 = scmp.ne.s32.totalorder %s265_s0, %s137_s13  ;;  %s16_s10 = int_to_ptr.vmem [resolvable:$true] %s15_s10 }
   0x4   :  { %p141_p1 = scmp.lt.u32.totalorder %s137_s13, %s265_s0 }
   0x6   :  { %p143_p2 = pnand %p141_p1, %p138_p0 }
   0x8   :  { %146 = shalt.err (!%p143_p2)
}
   0x9   :  { %s147_s18 = scalar_lea.vmem %s16_s10, 256  ;;  %p152_p4 = scmp.lt.s32.totalorder %s16_s10, %s16_s10 }
   0xa   :  { %p148_p3 = scmp.ne.s32.totalorder %s16_s10, %s147_s18  ;;  %p153_p5 = scmp.lt.s32.totalorder %s147_s18, %s147_s18 }
   0xc   :  { %p154_p6 = por %p153_p5, %p152_p4 }
   0xe   :  { %p155_p7 = pnand %p154_p6, %p148_p3 }
  0x10   :  { %158 = shalt.err (!%p155_p7)
}
  0x11   :  { %s210_s19 = smov 128   ;;  %s211_s20 = smov 8  }
  0x12   :  { %21 = dma.hbm_to_vmem [thread:$0]  %s265_s0, 256, %s16_s10, [#allocation3], %s210_s19, %s210_s19, %s211_s20  }
  0x13   :  { %s212_s23 = smov [#allocation5]   ;;  %s159_s27 = scalar_lea.hbm %s266_s1, 256 }
  0x14   :  { %s27_s24 = sshll.u32 %s212_s23, 4  ;;  %p160_p8 = scmp.ne.s32.totalorder %s266_s1, %s159_s27  ;;  %s28_s24 = int_to_ptr.vmem [resolvable:$true] %s27_s24 }
  0x15   :  { %p163_p9 = scmp.lt.u32.totalorder %s159_s27, %s266_s1 }
  0x17   :  { %p165_p10 = pnand %p163_p9, %p160_p8 }
  0x19   :  { %168 = shalt.err (!%p165_p10)
}
  0x1a   :  { %s169_s4 = scalar_lea.vmem %s28_s24, 256  ;;  %p174_p12 = scmp.lt.s32.totalorder %s28_s24, %s28_s24 }
  0x1b   :  { %p170_p11 = scmp.ne.s32.totalorder %s28_s24, %s169_s4  ;;  %p175_p13 = scmp.lt.s32.totalorder %s169_s4, %s169_s4 }
  0x1d   :  { %p176_p0 = por %p175_p13, %p174_p12 }
  0x1f   :  { %p177_p1 = pnand %p176_p0, %p170_p11 }
  0x21   :  { %180 = shalt.err (!%p177_p1)
}
  0x22   :  { %33 = dma.hbm_to_vmem [thread:$0]  %s266_s1, 256, %s28_s24, [#allocation6], %s210_s19, %s210_s19, %s211_s20  }
  0x23   :  { %203 = dma.done.wait [#allocation3], 256  }
  0x24   :  { %204 = vsyncadd [#allocation3], 4294967040 }
  0x25   :  { %205 = dma.done.wait [#allocation6], 256  }
  0x26   :  { %206 = vsyncadd [#allocation6], 4294967040  ;;  %v40_v0 = vld [vmem:[#allocation2] sm:$0xff]  ;;  %v41_v1 = vld [vmem:[#allocation2 + $0x8] sm:$0xff]  ;;  %s213_s1 = smov [#allocation7]  }
  0x27   :  { %v114_v2 = vmul.f32 -1.442695, %v40_v0  ;;  %v115_v3 = vmul.f32 -1.442695, %v41_v1  ;;  %v42_v14 = vld [vmem:[#allocation5] sm:$0xff]  ;;  %v43_v16 = vld [vmem:[#allocation5 + $0x8] sm:$0xff] }
  0x28   :  { %v76_v20 = vsub.f32 1.0, %v42_v14  ;;  %v77_v22 = vsub.f32 1.0, %v43_v16  ;;  %v58_v24 = vsub.f32 0.0, %v42_v14  ;;  %v59_v26 = vsub.f32 0.0, %v43_v16  ;;  %s104_s6 = sshll.u32 %s213_s1, 4  ;;  %s105_s6 = int_to_ptr.vmem [resolvable:$true] %s104_s6 }
  0x29   :  { %121 = vpow2.f32 %v114_v2  ;;  %s181_s7 = scalar_lea.vmem %s105_s6, 128  ;;  %p186_p3 = scmp.lt.s32.totalorder %s105_s6, %s105_s6 }
  0x2a   :  { %123 = vpow2.f32 %v115_v3  ;;  %v78_v28 = vsub.f32 0.0, %v76_v20  ;;  %v79_v30 = vsub.f32 0.0, %v77_v22  ;;  %p182_p2 = scmp.ne.s32.totalorder %s105_s6, %s181_s7  ;;  %p187_p4 = scmp.lt.s32.totalorder %s181_s7, %s181_s7 }
  0x2c   :  { %p188_p5 = por %p187_p4, %p186_p3 }
  0x2e   :  { %p189_p6 = pnand %p188_p5, %p182_p2 }
  0x33   :  { %v122_v4 = vpop.eup %121 }
  0x34   :  { %v124_v5 = vpop.eup %123  ;;  %v50_v6 = vadd.f32 1.0, %v122_v4 }
  0x35   :  { %v51_v7 = vadd.f32 1.0, %v124_v5 }
  0x36   :  { %125 = vrcp.f32 %v50_v6 }
  0x37   :  { %127 = vrcp.f32 %v51_v7 }
  0x40   :  { %v126_v8 = vpop.eup %125 }
  0x41   :  { %v128_v9 = vpop.eup %127  ;;  %v56_v10 = vsub.f32 1.0, %v126_v8  ;;  %v66_v11 = vadd.f32 1e-10, %v126_v8  ;;  %v80_v21 = vmul.f32 %v126_v8, %v126_v8 }
  0x42   :  { %v57_v12 = vsub.f32 1.0, %v128_v9  ;;  %v67_v13 = vadd.f32 1e-10, %v128_v9  ;;  %v81_v23 = vmul.f32 %v128_v9, %v128_v9 }
  0x43   :  { %129 = vlog2.f32 %v66_v11  ;;  %v86_v15 = vadd.f32 1e-10, %v56_v10  ;;  %v60_v17 = vmul.f32 %v56_v10, %v56_v10  ;;  %v82_v29 = vmul.f32 %v80_v21, %v80_v21 }
  0x44   :  { %131 = vlog2.f32 %v67_v13  ;;  %v87_v18 = vadd.f32 1e-10, %v57_v12  ;;  %v61_v19 = vmul.f32 %v57_v12, %v57_v12  ;;  %v83_v31 = vmul.f32 %v81_v23, %v81_v23 }
  0x45   :  { %133 = vlog2.f32 %v86_v15  ;;  %v62_v25 = vmul.f32 %v60_v17, %v60_v17  ;;  %v84_v37 = vmul.f32 %v82_v29, %v78_v28 }
  0x46   :  { %135 = vlog2.f32 %v87_v18  ;;  %v63_v27 = vmul.f32 %v61_v19, %v61_v19  ;;  %v85_v40 = vmul.f32 %v83_v31, %v79_v30 }
  0x47   :  { %v64_v32 = vmul.f32 %v62_v25, %v58_v24 }
  0x48   :  { %v65_v34 = vmul.f32 %v63_v27, %v59_v26 }
  0x4d   :  { %v130_v33 = vpop.eup %129 }
  0x4e   :  { %v132_v35 = vpop.eup %131  ;;  %v69_v36 = vmul.f32 0.6931472, %v130_v33 }
  0x4f   :  { %v134_v38 = vpop.eup %133  ;;  %v71_v39 = vmul.f32 0.6931472, %v132_v35 }
  0x50   :  { %v136_v41 = vpop.eup %135  ;;  %v72_v42 = vmul.f32 %v69_v36, %v64_v32  ;;  %v89_v43 = vmul.f32 0.6931472, %v134_v38 }
  0x51   :  { %v73_v44 = vmul.f32 %v71_v39, %v65_v34  ;;  %v91_v45 = vmul.f32 0.6931472, %v136_v41 }
  0x52   :  { %v74_v46 = vmul.f32 2.0, %v72_v42  ;;  %v92_v47 = vmul.f32 %v89_v43, %v84_v37 }
  0x53   :  { %v75_v48 = vmul.f32 2.0, %v73_v44  ;;  %v93_v49 = vmul.f32 %v91_v45, %v85_v40 }
  0x54   :  { %v94_v50 = vadd.f32 %v92_v47, %v74_v46 }
  0x55   :  { %v95_v51 = vadd.f32 %v93_v49, %v75_v48 }
  0x57   :  { %v96_v52 = vadd.f32 %v95_v51, %v94_v50 }
  0x59   :  { %97 = vst [vmem:[#allocation7] sm:$0xff] %v96_v52 }
  0x5a   :  { %192 = shalt.err (!%p189_p6)
}
  0x5b   :  { %s193_s10 = scalar_lea.hbm %s267_s2, 128 }
  0x5c   :  { %p194_p7 = scmp.ne.s32.totalorder %s267_s2, %s193_s10  ;;  %p197_p8 = scmp.lt.u32.totalorder %s193_s10, %s267_s2 }
  0x5e   :  { %p199_p9 = pnand %p197_p8, %p194_p7 }
  0x60   :  { %202 = shalt.err (!%p199_p9)
}
  0x61   :  { %107 = dma.vmem_to_hbm [thread:$0]  %s105_s6, 128, %s267_s2, [#allocation4]  }
  0x62   :  { %207 = dma.done.wait [#allocation4], 128  }
  0x63   :  { %208 = vsyncadd [#allocation4], 4294967168 }
  0x64   :  { %111 = vsyncpa [#allocation3], 1 }
  0x65   :  { %112 = vsyncpa [#allocation6], 1 }
  0x66   :  { %113 = vsyncpa [#allocation4], 1 }

</bundles_post_ra>
